<compile_context>
chip_gen: v7x
topology: tpu7x:2x2x1
jax: 0.10.0
libtpu: 0.0.40
codegen_flags: <defaults>
</compile_context>

<pallas_src>
import jax
import jax.numpy as jnp
from jax.experimental import pallas as pl
from jax.experimental.pallas import tpu as pltpu


def _round_up(x, m):
    return ((x + m - 1) // m) * m


def fcq_kernel(x_ref, w1_ref, b1_ref, w2_ref, b2_ref, w3_ref, b3_ref, out_ref):
    """Fused MLP: two ReLU hidden layers + linear output, one batch tile per grid step.

    Weights arrive in bf16 / (in, out) layout; biases in f32 / (1, out).
    Matmuls run bf16 x bf16 -> f32 on the MXU; bias add stays in f32; ReLU runs on
    the bf16 downcast (same math, half the vreg traffic on bf16-VALU chips).
    """
    x = x_ref[...].astype(jnp.bfloat16)

    # Layer 1: (TB, S) @ (S, H1) -> f32, + (1, H1), bf16 ReLU
    h1 = jnp.dot(x, w1_ref[...], preferred_element_type=jnp.float32) + b1_ref[...]
    h1 = jnp.maximum(h1.astype(jnp.bfloat16), 0.0)

    # Layer 2: (TB, H1) @ (H1, H2) -> f32, + (1, H2), bf16 ReLU
    h2 = jnp.dot(h1, w2_ref[...], preferred_element_type=jnp.float32) + b2_ref[...]
    h2 = jnp.maximum(h2.astype(jnp.bfloat16), 0.0)

    # Output layer: (TB, H2) @ (H2, A) -> f32, + (1, A); narrow masked store.
    q = jnp.dot(h2, w3_ref[...], preferred_element_type=jnp.float32) + b3_ref[...]
    out_ref[...] = q.astype(out_ref.dtype)


def prepare_params(params):
    """One-time conversion of PyTorch-convention params to kernel-ready layout.

    PyTorch convention: w (out, in), b (out,).
    Kernel convention : w (in, out) bf16, b (1, out) f32.  No lane padding of the
    output layer — the narrow masked store beats a 32x-padded f32 writeback.
    Call once; reuse the returned pytree for every fcq_forward call.
    """
    w1 = params["w1"].T.astype(jnp.bfloat16)              # (S,  H1)
    w2 = params["w2"].T.astype(jnp.bfloat16)              # (H1, H2)
    w3 = params["w3"].T.astype(jnp.bfloat16)              # (H2, A)

    b1 = params["b1"].reshape(1, -1).astype(jnp.float32)  # (1, H1)
    b2 = params["b2"].reshape(1, -1).astype(jnp.float32)  # (1, H2)
    b3 = params["b3"].reshape(1, -1).astype(jnp.float32)  # (1, A)

    return {"w1": w1, "b1": b1, "w2": w2, "b2": b2, "w3": w3, "b3": b3,
            "action_size": int(params["w3"].shape[0])}


def fcq_forward(state, prepared, *, batch_tile=2048):
    """Run the FCQNetwork forward pass with a single batch-tiled pallas_call.

    state    : (B, state_size) float32 (bf16 also accepted — halves input DMA)
    prepared : output of prepare_params()
    """
    B, S = state.shape
    H1 = prepared["w1"].shape[1]
    H2 = prepared["w2"].shape[1]
    A = prepared["w3"].shape[1]

    # Batch-tile selection:
    #  * TB is a multiple of 8 (sublane alignment); the batch is padded, not the tile.
    #  * If the whole batch fits in <= 2 tiles, split it in two so the "parallel"
    #    grid axis can feed both v7x TensorCores (single-TC chips are unaffected).
    if B <= 2 * batch_tile:
        TB = _round_up(max(pl.cdiv(B, 2), 8), 8)
    else:
        TB = _round_up(batch_tile, 8)
    num_tiles = pl.cdiv(B, TB)
    B_pad = num_tiles * TB
    x = state if B_pad == B else jnp.pad(state, ((0, B_pad - B), (0, 0)))

    # Weights/biases: constant index_map -> stay resident in VMEM, never re-DMA'd.
    resident = lambda shape: pl.BlockSpec(shape, lambda i: (0, 0))

    # Streamed state/output specs; for long grids use 3-deep buffering since the
    # per-tile compute is tiny relative to DMA start latency.
    if num_tiles >= 4:
        state_spec = pl.BlockSpec((TB, S), lambda i: (i, 0),
                                  pipeline_mode=pl.Buffered(3))
        out_spec = pl.BlockSpec((TB, A), lambda i: (i, 0),
                                pipeline_mode=pl.Buffered(3))
    else:
        state_spec = pl.BlockSpec((TB, S), lambda i: (i, 0))
        out_spec = pl.BlockSpec((TB, A), lambda i: (i, 0))

    flops = 2 * B_pad * (S * H1 + H1 * H2 + H2 * A)
    bytes_accessed = (
        B_pad * S * x.dtype.itemsize          # streamed state
        + (S * H1 + H1 * H2 + H2 * A) * 2     # bf16 weights (loaded once)
        + (H1 + H2 + A) * 4                   # f32 biases
        + B_pad * A * 4                       # f32 output (narrow, unpadded)
    )

    out = pl.pallas_call(
        fcq_kernel,
        out_shape=jax.ShapeDtypeStruct((B_pad, A), jnp.float32),
        grid=(num_tiles,),
        in_specs=[
            state_spec,                              # state: streamed per tile
            resident((S, H1)),  resident((1, H1)),   # layer 1 weights/bias
            resident((H1, H2)), resident((1, H2)),   # layer 2 weights/bias
            resident((H2, A)),  resident((1, A)),    # output layer (unpadded)
        ],
        out_specs=out_spec,
        compiler_params=pltpu.CompilerParams(
            dimension_semantics=("parallel",)),      # v7x: shard tiles across 2 TCs
        cost_estimate=pl.CostEstimate(
            flops=flops, transcendentals=0, bytes_accessed=bytes_accessed),
    )(x, prepared["w1"], prepared["b1"],
      prepared["w2"], prepared["b2"],
      prepared["w3"], prepared["b3"])

    return out if B_pad == B else out[:B]


def init_params(key, state_size, action_size, fc1_units=64, fc2_units=64):
    """Deterministic init mimicking PyTorch nn.Linear default (uniform +-1/sqrt(fan_in))."""
    ks = jax.random.split(key, 6)

    def linear(kw, kb, fan_in, fan_out):
        bound = 1.0 / jnp.sqrt(jnp.float32(fan_in))
        w = jax.random.uniform(kw, (fan_out, fan_in), jnp.float32, -bound, bound)
        b = jax.random.uniform(kb, (fan_out,), jnp.float32, -bound, bound)
        return w, b

    w1, b1 = linear(ks[0], ks[1], state_size, fc1_units)
    w2, b2 = linear(ks[2], ks[3], fc1_units, fc2_units)
    w3, b3 = linear(ks[4], ks[5], fc2_units, action_size)
    return {"w1": w1, "b1": b1, "w2": w2, "b2": b2, "w3": w3, "b3": b3}


def fcq_reference_f32(state, p):
    """Pure-f32 JAX reference with PyTorch semantics (loose check on the bf16 kernel)."""
    h1 = jnp.maximum(state @ p["w1"].T + p["b1"], 0.0)
    h2 = jnp.maximum(h1 @ p["w2"].T + p["b2"], 0.0)
    return h2 @ p["w3"].T + p["b3"]


def fcq_reference_prepared(state, prepared):
    """Faithful reference of the kernel math (bf16 matmul inputs, f32 accum, bf16 ReLU)."""
    x = state.astype(jnp.bfloat16)
    h1 = jnp.dot(x, prepared["w1"], preferred_element_type=jnp.float32) + prepared["b1"]
    h1 = jnp.maximum(h1.astype(jnp.bfloat16), 0.0)
    h2 = jnp.dot(h1, prepared["w2"], preferred_element_type=jnp.float32) + prepared["b2"]
    h2 = jnp.maximum(h2.astype(jnp.bfloat16), 0.0)
    return jnp.dot(h2, prepared["w3"], preferred_element_type=jnp.float32) + prepared["b3"]


if __name__ == "__main__":
    key = jax.random.PRNGKey(0)
    k_params, k_state = jax.random.split(key)

    state_size, action_size, fc1_units, fc2_units = 8, 4, 64, 64
    params = init_params(k_params, state_size, action_size, fc1_units, fc2_units)
    prepared = prepare_params(params)  # one-time weight layout conversion

    # (batch, batch_tile) cases:
    #   (8, 2048)  : single-tile RL-step-like call
    #   (512, 2048): 2 tiles -> exercises the >=2-tile (v7x dual-TC) path
    #   (512, 64)  : 8 tiles -> exercises the deep-pipeline (Buffered(3)) path
    for B, bt in ((8, 2048), (512, 2048), (512, 64)):
        k_b = jax.random.fold_in(k_state, B)
        state = jax.random.normal(k_b, (B, state_size), dtype=jnp.float32)

        q = fcq_forward(state, prepared, batch_tile=bt)
        jax.block_until_ready(q)
        assert q.shape == (B, action_size)

        # Tight check vs. a reference using the exact kernel math (bf16-in, f32-acc).
        q_kernel_ref = fcq_reference_prepared(state, prepared)
        assert jnp.allclose(q, q_kernel_ref, atol=1e-3, rtol=1e-3), "mismatch vs bf16 reference"

        # Loose check vs. the pure-f32 PyTorch-semantics reference (bf16 rounding).
        q_f32_ref = fcq_reference_f32(state, params)
        assert jnp.allclose(q, q_f32_ref, atol=1e-1, rtol=1e-1), "mismatch vs f32 reference"

    print("KERNEL_OK")
</pallas_src>

<mosaic_0001>
module attributes {stable_mosaic.version = 11 : i64} {
  func.func @fcq_kernel(%arg0: i32, %arg1: memref<8x8xf32, #tpu.memory_space<vmem>>, %arg2: memref<8x64xbf16, #tpu.memory_space<vmem>>, %arg3: memref<1x64xf32, #tpu.memory_space<vmem>>, %arg4: memref<64x64xbf16, #tpu.memory_space<vmem>>, %arg5: memref<1x64xf32, #tpu.memory_space<vmem>>, %arg6: memref<64x4xbf16, #tpu.memory_space<vmem>>, %arg7: memref<1x4xf32, #tpu.memory_space<vmem>>, %arg8: memref<8x4xf32, #tpu.memory_space<vmem>>) attributes {dimension_semantics = [#tpu.dimension_semantics<parallel>], iteration_bounds = array<i64: 1>, scalar_prefetch = 0 : i64, scratch_operands = 0 : i64, tpu.core_type = #tpu.core_type<tc>, window_params = [{transform_indices = @transform_0, window_bounds = array<i64: 8, 8>}, {pipeline_mode = #tpu.pipeline_mode<synchronous>, transform_indices = @transform_1, window_bounds = array<i64: 8, 64>}, {pipeline_mode = #tpu.pipeline_mode<synchronous>, transform_indices = @transform_2, window_bounds = array<i64: 1, 64>}, {pipeline_mode = #tpu.pipeline_mode<synchronous>, transform_indices = @transform_3, window_bounds = array<i64: 64, 64>}, {pipeline_mode = #tpu.pipeline_mode<synchronous>, transform_indices = @transform_4, window_bounds = array<i64: 1, 64>}, {pipeline_mode = #tpu.pipeline_mode<synchronous>, transform_indices = @transform_5, window_bounds = array<i64: 64, 4>}, {pipeline_mode = #tpu.pipeline_mode<synchronous>, transform_indices = @transform_6, window_bounds = array<i64: 1, 4>}, {transform_indices = @transform_7, window_bounds = array<i64: 8, 4>}]} {
    %c0 = arith.constant 0 : index
    %c0_0 = arith.constant 0 : index
    %0 = vector.load %arg1[%c0, %c0_0] : memref<8x8xf32, #tpu.memory_space<vmem>>, vector<8x8xf32>
    %1 = arith.truncf %0 : vector<8x8xf32> to vector<8x8xbf16>
    %c0_1 = arith.constant 0 : index
    %c0_2 = arith.constant 0 : index
    %2 = vector.load %arg2[%c0_1, %c0_2] : memref<8x64xbf16, #tpu.memory_space<vmem>>, vector<8x64xbf16>
    %cst = arith.constant dense<0.000000e+00> : vector<8x64xf32>
    %3 = tpu.matmul %1, %2, %cst {dimension_numbers = #tpu.dot_dimension_numbers<[1], [0], [0], [1], [0, 0, 1, 1], [], []>} : vector<8x8xbf16>, vector<8x64xbf16>, vector<8x64xf32> -> vector<8x64xf32>
    %c0_3 = arith.constant 0 : index
    %c0_4 = arith.constant 0 : index
    %4 = vector.load %arg3[%c0_3, %c0_4] : memref<1x64xf32, #tpu.memory_space<vmem>>, vector<1x64xf32>
    %5 = vector.broadcast %4 : vector<1x64xf32> to vector<8x64xf32>
    %6 = arith.addf %3, %5 : vector<8x64xf32>
    %7 = arith.truncf %6 : vector<8x64xf32> to vector<8x64xbf16>
    %cst_5 = arith.constant 0.000000e+00 : bf16
    %8 = vector.broadcast %cst_5 : bf16 to vector<8x64xbf16>
    %9 = arith.maximumf %7, %8 : vector<8x64xbf16>
    %c0_6 = arith.constant 0 : index
    %c0_7 = arith.constant 0 : index
    %10 = vector.load %arg4[%c0_6, %c0_7] : memref<64x64xbf16, #tpu.memory_space<vmem>>, vector<64x64xbf16>
    %cst_8 = arith.constant dense<0.000000e+00> : vector<8x64xf32>
    %11 = tpu.matmul %9, %10, %cst_8 {dimension_numbers = #tpu.dot_dimension_numbers<[1], [0], [0], [1], [0, 0, 1, 1], [], []>} : vector<8x64xbf16>, vector<64x64xbf16>, vector<8x64xf32> -> vector<8x64xf32>
    %c0_9 = arith.constant 0 : index
    %c0_10 = arith.constant 0 : index
    %12 = vector.load %arg5[%c0_9, %c0_10] : memref<1x64xf32, #tpu.memory_space<vmem>>, vector<1x64xf32>
    %13 = vector.broadcast %12 : vector<1x64xf32> to vector<8x64xf32>
    %14 = arith.addf %11, %13 : vector<8x64xf32>
    %15 = arith.truncf %14 : vector<8x64xf32> to vector<8x64xbf16>
    %cst_11 = arith.constant 0.000000e+00 : bf16
    %16 = vector.broadcast %cst_11 : bf16 to vector<8x64xbf16>
    %17 = arith.maximumf %15, %16 : vector<8x64xbf16>
    %c0_12 = arith.constant 0 : index
    %c0_13 = arith.constant 0 : index
    %18 = vector.load %arg6[%c0_12, %c0_13] : memref<64x4xbf16, #tpu.memory_space<vmem>>, vector<64x4xbf16>
    %cst_14 = arith.constant dense<0.000000e+00> : vector<8x4xf32>
    %19 = tpu.matmul %17, %18, %cst_14 {dimension_numbers = #tpu.dot_dimension_numbers<[1], [0], [0], [1], [0, 0, 1, 1], [], []>} : vector<8x64xbf16>, vector<64x4xbf16>, vector<8x4xf32> -> vector<8x4xf32>
    %c0_15 = arith.constant 0 : index
    %c0_16 = arith.constant 0 : index
    %20 = vector.load %arg7[%c0_15, %c0_16] : memref<1x4xf32, #tpu.memory_space<vmem>>, vector<1x4xf32>
    %21 = vector.broadcast %20 : vector<1x4xf32> to vector<8x4xf32>
    %22 = arith.addf %19, %21 : vector<8x4xf32>
    %c0_17 = arith.constant 0 : index
    %c0_18 = arith.constant 0 : index
    %23 = vector.load %arg8[%c0_17, %c0_18] : memref<8x4xf32, #tpu.memory_space<vmem>>, vector<8x4xf32>
    tpu.vector_store %arg8[%c0_17, %c0_18], %22 {strides = array<i32>} : memref<8x4xf32, #tpu.memory_space<vmem>>, vector<8x4xf32>,
    return
  }
  func.func @transform_0(%arg0: i32) -> (i32, i32) {
    %c0_i32 = arith.constant 0 : i32
    %c0_i32_0 = arith.constant 0 : i32
    return %arg0, %c0_i32 : i32, i32
  }
  func.func @transform_1(%arg0: i32) -> (i32, i32) {
    %c0_i32 = arith.constant 0 : i32
    %c0_i32_0 = arith.constant 0 : i32
    %c0_i32_1 = arith.constant 0 : i32
    return %c0_i32, %c0_i32_0 : i32, i32
  }
  func.func @transform_2(%arg0: i32) -> (i32, i32) {
    %c0_i32 = arith.constant 0 : i32
    %c0_i32_0 = arith.constant 0 : i32
    %c0_i32_1 = arith.constant 0 : i32
    return %c0_i32, %c0_i32_0 : i32, i32
  }
  func.func @transform_3(%arg0: i32) -> (i32, i32) {
    %c0_i32 = arith.constant 0 : i32
    %c0_i32_0 = arith.constant 0 : i32
    %c0_i32_1 = arith.constant 0 : i32
    return %c0_i32, %c0_i32_0 : i32, i32
  }
  func.func @transform_4(%arg0: i32) -> (i32, i32) {
    %c0_i32 = arith.constant 0 : i32
    %c0_i32_0 = arith.constant 0 : i32
    %c0_i32_1 = arith.constant 0 : i32
    return %c0_i32, %c0_i32_0 : i32, i32
  }
  func.func @transform_5(%arg0: i32) -> (i32, i32) {
    %c0_i32 = arith.constant 0 : i32
    %c0_i32_0 = arith.constant 0 : i32
    %c0_i32_1 = arith.constant 0 : i32
    return %c0_i32, %c0_i32_0 : i32, i32
  }
  func.func @transform_6(%arg0: i32) -> (i32, i32) {
    %c0_i32 = arith.constant 0 : i32
    %c0_i32_0 = arith.constant 0 : i32
    %c0_i32_1 = arith.constant 0 : i32
    return %c0_i32, %c0_i32_0 : i32, i32
  }
  func.func @transform_7(%arg0: i32) -> (i32, i32) {
    %c0_i32 = arith.constant 0 : i32
    %c0_i32_0 = arith.constant 0 : i32
    return %arg0, %c0_i32 : i32, i32
  }
}

</mosaic_0001>

<bundles_post_ra>
// kernel: tpu_custom_call.1
= control target key start
LH: loop header
LB: loop body
LE: loop exit
PB: predicated region body
PF: predicated region fallthrough
CT: control target
= control target key end

     0   :  { %vm41_vm0 = vcmask 1043456   ;;  %v327_v0 = vmov 0.0   ;;  %vm328_vm1 = vmmov 0   ;;  %vm37_vm2 = vcmask 64512   ;;  %s414_s1 = inlined_call_operand.vmem [shape: bf16[8,64], index: 1, kind: input, shape index: {}]   ;;  %s415_s0 = inlined_call_operand.vmem [shape: f32[8,8], index: 0, kind: input, shape index: {}]   ;;  %s416_s3 = inlined_call_operand.vmem [shape: bf16[64,64], index: 3, kind: input, shape index: {}]   ;;  %s417_s5 = inlined_call_operand.vmem [shape: bf16[64,4], index: 5, kind: input, shape index: {}]   ;;  %s418_s2 = inlined_call_operand.vmem [shape: f32[1,64], index: 2, kind: input, shape index: {}]   ;;  %s419_s4 = inlined_call_operand.vmem [shape: f32[1,64], index: 4, kind: input, shape index: {}]   ;;  %s420_s6 = inlined_call_operand.vmem [shape: f32[1,4], index: 6, kind: input, shape index: {}]   ;;  %s421_s7 = inlined_call_operand.vmem [shape: f32[8,4], index: 7, kind: output, shape index: {}]  }
   0x1   :  { %286 = vmatprep.subr.bf16.mxu0 %v327_v0  ;;  %v29_v1 = vld [vmem:[%s414_s1] sm:$0xf]  ;;  %288 = vmatprep.mubr.msk.bf16.mxu0 %vm328_vm1, %v327_v0  ;;  %v320_v6 = vld [vmem:[%s416_s3 + $0x8] sm:$0xff]   ;;  %v321_v7 = vld [vmem:[%s416_s3 + $0x10] sm:$0xff]   ;;  %vm126_vm3 = vcmask 523264   ;;  %v329_v18 = vmov 0  }
   0x2   :  { %v27_v2 = vld [vmem:[%s415_s0] sm:$0xff]  ;;  %v43_v3 = vsel %vm41_vm0, %v29_v1, 0  ;;  %292 = vmatprep.subr.bf16.mxu1 %v327_v0  ;;  %300 = vmatprep.mubr.msk.bf16.mxu1 %vm328_vm1, %v327_v0  ;;  %v322_v8 = vld [vmem:[%s416_s3 + $0x18] sm:$0xff]   ;;  %v324_v10 = vld [vmem:[%s417_s5 + $0x8] sm:$0xff]   ;;  %vm254_vm4 = vcmask 31744  }
   0x3   :  { %v28_v4 = vpack.c.bf16 %v27_v2, %v27_v2  ;;  %v319_v5 = vld [vmem:[%s416_s3] sm:$0xff]   ;;  %287 = vmatpush3.bf16.msra.mxu0 %v43_v3  ;;  %v325_v20 = vld [vmem:[%s417_s5 + $0x10] sm:$0xff]   ;;  %v326_v21 = vld [vmem:[%s417_s5 + $0x18] sm:$0xff]  }
   0x4   :  { %293 = vmatpush3.bf16.msra.mxu1 %v319_v5  ;;  %304 = vmatprep.subr.bf16.mxu0 %v327_v0  ;;  %v323_v9 = vld [vmem:[%s417_s5] sm:$0xff]  }
   0x5   :  { %294 = vmatprep.subr.bf16.mxu1 %v327_v0  ;;  %v260_v11 = vld [vmem:[%s418_s2] ss:$0 sm:$0xff] }
   0x6   :  { %289 = vmatmul.mubr.msk.bf16.vlgmr.msra.gmra.mrb[0].mxu0 %vm37_vm2, %v28_v4  ;;  %v262_v22 = vld [vmem:[%s419_s4] ss:$0 sm:$0xff] }
   0x7   :  { %312 = vmatprep.mubr.msk.bf16.mxu0 %vm328_vm1, %v327_v0  ;;  %305 = vmatpush3.bf16.msra.mxu0 %v323_v9  ;;  %v268_v30 = vld [vmem:[%s420_s6] ss:$0 sm:$0xff] }
   0x8   :  { %295 = vmatpush3.bf16.msra.mxu1 %v320_v6  ;;  %306 = vmatprep.subr.bf16.mxu0 %v327_v0 }
   0x9   :  { %296 = vmatprep.subr.bf16.mxu1 %v327_v0 }
   0xb   :  { %307 = vmatpush3.bf16.msra.mxu0 %v324_v10 }
   0xc   :  { %297 = vmatpush3.bf16.msra.mxu1 %v321_v7  ;;  %308 = vmatprep.subr.bf16.mxu0 %v327_v0 }
   0xd   :  { %298 = vmatprep.subr.bf16.mxu1 %v327_v0 }
   0xf   :  { %309 = vmatpush3.bf16.msra.mxu0 %v325_v20 }
  0x10   :  { %299 = vmatpush3.bf16.msra.mxu1 %v322_v8  ;;  %310 = vmatprep.subr.bf16.mxu0 %v327_v0 }
  0x13   :  { %311 = vmatpush3.bf16.msra.mxu0 %v326_v21 }
  0xd9   :  { %v79_v12 = vpop.f32.mrb[0].mxu0 }
  0xda   :  { %v80_v13 = vadd.f32 %v260_v11, %v79_v12  ;;  %v290_v14 = vpop.f32.mrb[1].mxu0 }
  0xdb   :  { %v82_v15 = vpop.f32.mrb[2].mxu0 }
  0xdc   :  { %v85_v16 = vpack.c.bf16 %v80_v13, %v80_v13  ;;  %v291_v17 = vpop.f32.mrb[3].mxu0 }
  0xde   :  { %v86_v19 = vmax.bf16 %v329_v18, %v85_v16 }
  0xe0   :  { %301 = vmatmul.mubr.msk.bf16.vlgmr.msra.gmra.mrb[0].mxu1 %vm126_vm3, %v86_v19 }
 0x1b3   :  { %v164_v23 = vpop.f32.mrb[0].mxu1 }
 0x1b4   :  { %v165_v24 = vadd.f32 %v262_v22, %v164_v23  ;;  %v302_v25 = vpop.f32.mrb[1].mxu1 }
 0x1b5   :  { %v167_v26 = vpop.f32.mrb[2].mxu1 }
 0x1b6   :  { %v170_v27 = vpack.c.bf16 %v165_v24, %v165_v24  ;;  %v303_v28 = vpop.f32.mrb[3].mxu1 }
 0x1b8   :  { %v171_v29 = vmax.bf16 %v329_v18, %v170_v27 }
 0x1ba   :  { %313 = vmatmul.mubr.msk.bf16.vlgmr.msra.gmra.mrb[4].mxu0 %vm126_vm3, %v171_v29 }
 0x28d   :  { %v248_v31 = vpop.f32.mrb[4].mxu0 }
 0x28e   :  { %v249_v32 = vadd.f32 %v268_v30, %v248_v31  ;;  %v314_v33 = vpop.f32.mrb[5].mxu0 }
 0x28f   :  { %v251_v34 = vpop.f32.mrb[6].mxu0 }
 0x290   :  { %255 = vst.msk [vmem:[%s421_s7] sm:$0xff] %vm254_vm4, %v249_v32  ;;  %v315_v35 = vpop.f32.mrb[7].mxu0 }

</bundles_post_ra>
